<compile_context>
chip_gen: v7x
topology: tpu7x:2x2x1
jax: 0.10.0
libtpu: 0.0.40
codegen_flags: <defaults>
</compile_context>

<pallas_src>
import math

import numpy as np

import jax
import jax.numpy as jnp
from jax import lax
from jax.experimental import pallas as pl
from jax.experimental.pallas import tpu as pltpu


# ---------------------------------------------------------------------------
# Host-side construction of the bilinear interpolation matrix
# (exactly mirrors PyTorch's align_corners=False source-index computation).
# ---------------------------------------------------------------------------
def _linear_interp_matrix(in_size: int, out_size: int) -> np.ndarray:
    """Returns A (out_size, in_size) with A @ v == 1-D bilinear resize of v."""
    scale = in_size / out_size
    i = np.arange(out_size, dtype=np.float64)
    src = np.maximum((i + 0.5) * scale - 0.5, 0.0)        # clamp negatives to 0
    i0 = np.minimum(np.floor(src).astype(np.int64), in_size - 1)
    i1 = np.minimum(i0 + 1, in_size - 1)
    frac = src - i0
    A = np.zeros((out_size, in_size), dtype=np.float64)
    A[np.arange(out_size), i0] += 1.0 - frac
    A[np.arange(out_size), i1] += frac
    return A


def _bilinear_token_matrix(h: int, w: int, out_h: int, out_w: int) -> np.ndarray:
    """(out_h*out_w, h*w) matrix: row o = (oy*out_w+ox), col t = (y*w+x)."""
    Ay = _linear_interp_matrix(h, out_h)
    Ax = _linear_interp_matrix(w, out_w)
    return np.kron(Ay, Ax).astype(np.float32)


# ---------------------------------------------------------------------------
# Block-size selection helpers (host side, trace time).
# ---------------------------------------------------------------------------
def _pick_batch_block(B, n, c, out_n_pad, x_item, m_item,
                      bt_max=8, budget=32 * 1024 * 1024):
    """Largest BT <= bt_max whose double-buffered blocks fit the VMEM budget."""
    def fits(bt):
        est = (2 * bt * n * c * x_item            # x double buffer
               + 2 * bt * out_n_pad * c * x_item  # out double buffer
               + 2 * out_n_pad * n * m_item)      # M (constant block)
        return est <= budget
    # First pass: prefer a BT that divides B exactly (no partial last block).
    for bt in range(min(bt_max, B), 0, -1):
        if B % bt == 0 and fits(bt):
            return bt
    for bt in range(min(bt_max, B), 0, -1):
        if fits(bt):
            return bt
    return 1


def _pick_channel_block(C, num_b_blocks):
    """Split C only when batch blocks alone can't feed 2 TCs (v7x) AND the
    split stays lane-dense (multiple of 128) and >= 512 lanes per block."""
    if num_b_blocks >= 2:
        return C
    for parts in (2, 3, 4):
        cb = C // parts
        if C % parts == 0 and cb >= 512 and cb % 128 == 0:
            return cb
    return C


# ---------------------------------------------------------------------------
# Pallas kernel: one grid step = BT batch elements x one channel block.
# ---------------------------------------------------------------------------
def token_down_kernel(x_ref, m_ref, o_ref):
    """x_ref: (BT, n, cb); m_ref: (out_n_pad, n); o_ref: (BT, out_n_pad, cb)."""
    m = m_ref[...]                       # load once, reuse for all BT matmuls

    def body(b, carry):
        y = jnp.dot(m, x_ref[b], preferred_element_type=jnp.float32)
        o_ref[b] = y.astype(o_ref.dtype)
        return carry

    lax.fori_loop(0, x_ref.shape[0], body, 0, unroll=True)


def token_down_forward(x, output_size):
    """x: (B, N, C), N a perfect square. Returns (B, out_h*out_w, C) in x.dtype.

    Call under jax.jit with output_size static so the interpolation matrix is
    baked as a device constant.
    """
    B, n, c = x.shape
    h = int(math.isqrt(n))
    assert h * h == n, "num_tokens must be a perfect square"
    out_h, out_w = output_size
    out_n = out_h * out_w

    # bf16 operands (f32 accumulate) when the activations are bf16; keep f32
    # operands for an f32 input so we match the reference closely.
    m_dtype = jnp.bfloat16 if x.dtype == jnp.bfloat16 else jnp.float32
    x_item = jnp.dtype(x.dtype).itemsize
    m_item = jnp.dtype(m_dtype).itemsize

    # Pad out_n up to the sublane tile (8 f32, 16 bf16) so the output
    # writeback is full-rate unmasked vst; padding rows of M are zero.
    sublane = max(8, 32 // x_item)
    out_n_pad = ((out_n + sublane - 1) // sublane) * sublane

    m_np = np.zeros((out_n_pad, n), dtype=np.float32)
    m_np[:out_n] = _bilinear_token_matrix(h, h, out_h, out_w)
    m = jnp.asarray(m_np, dtype=m_dtype)

    # Pipeline granularity: BT batch elements per step, optional C split.
    bt = _pick_batch_block(B, n, c, out_n_pad, x_item, m_item)
    num_b_blocks = pl.cdiv(B, bt)
    cb = _pick_channel_block(c, num_b_blocks)
    num_c_blocks = c // cb

    est_vmem = (2 * bt * n * cb * x_item
                + 2 * bt * out_n_pad * cb * x_item
                + 2 * out_n_pad * n * m_item)
    vmem_limit = int(min(64 << 20, max(32 << 20, est_vmem + (8 << 20))))

    cost = pl.CostEstimate(
        flops=2 * B * out_n_pad * n * c,
        transcendentals=0,
        bytes_accessed=(B * n * c * x_item
                        + out_n_pad * n * m_item
                        + B * out_n_pad * c * x_item),
    )

    grid_spec = pltpu.PrefetchScalarGridSpec(
        num_scalar_prefetch=0,
        grid=(num_b_blocks, num_c_blocks),
        in_specs=[
            # x: BT batch elements x one channel block per step.
            pl.BlockSpec((bt, n, cb), lambda b, j: (b, 0, j)),
            # M: constant block index -> fetched once, reused every step.
            pl.BlockSpec((out_n_pad, n), lambda b, j: (0, 0)),
        ],
        out_specs=pl.BlockSpec((bt, out_n_pad, cb), lambda b, j: (b, 0, j)),
    )

    out_padded = pl.pallas_call(
        token_down_kernel,
        out_shape=jax.ShapeDtypeStruct((B, out_n_pad, c), x.dtype),
        grid_spec=grid_spec,
        compiler_params=pltpu.CompilerParams(
            # Both axes are independent -> v7x can shard across its 2 TCs.
            dimension_semantics=("parallel", "parallel"),
            vmem_limit_bytes=vmem_limit,
        ),
        cost_estimate=cost,
    )(x, m)

    if out_n_pad == out_n:
        return out_padded
    return out_padded[:, :out_n, :]


# ---------------------------------------------------------------------------
# Independent (gather-based) pure-JAX reference mirroring PyTorch semantics.
# ---------------------------------------------------------------------------
def token_down_reference(x, output_size):
    b, n, c = x.shape
    h = int(math.isqrt(n))
    w = h
    out_h, out_w = output_size
    xf = x.astype(jnp.float32).reshape(b, h, w, c)

    def src(in_size, out_size):
        scale = in_size / out_size
        i = np.arange(out_size, dtype=np.float64)
        s = np.maximum((i + 0.5) * scale - 0.5, 0.0)
        i0 = np.minimum(np.floor(s).astype(np.int64), in_size - 1)
        i1 = np.minimum(i0 + 1, in_size - 1)
        frac = (s - i0).astype(np.float32)
        return i0, i1, frac

    y0, y1, fy = src(h, out_h)
    x0, x1, fx = src(w, out_w)
    fy = jnp.asarray(fy)[None, :, None, None]
    fx = jnp.asarray(fx)[None, None, :, None]

    r0 = xf[:, y0]                                   # (b, out_h, w, c)
    r1 = xf[:, y1]
    top = r0[:, :, x0] * (1.0 - fx) + r0[:, :, x1] * fx   # (b, out_h, out_w, c)
    bot = r1[:, :, x0] * (1.0 - fx) + r1[:, :, x1] * fx
    out = top * (1.0 - fy) + bot * fy
    return out.reshape(b, out_h * out_w, c).astype(x.dtype)


if __name__ == "__main__":
    key = jax.random.PRNGKey(0)
    k1, k2, k3 = jax.random.split(key, 3)

    fwd = jax.jit(token_down_forward, static_argnames=("output_size",))

    # Test 1: bf16 activations, lane-dense channels (C = 128), 8x8 -> 4x4.
    B, H_IN, C = 2, 8, 128
    N = H_IN * H_IN
    OUT_HW = (4, 4)
    x = jax.random.normal(k1, (B, N, C), dtype=jnp.float32).astype(jnp.bfloat16)

    out = jax.block_until_ready(fwd(x, output_size=OUT_HW))
    ref = jax.block_until_ready(token_down_reference(x, OUT_HW))
    assert out.shape == (B, OUT_HW[0] * OUT_HW[1], C), out.shape
    assert out.dtype == x.dtype, out.dtype
    err = float(jnp.max(jnp.abs(out.astype(jnp.float32) - ref.astype(jnp.float32))))
    assert err < 5e-2, f"bf16 max abs err too large: {err}"

    # Test 2: f32 activations, unaligned out_n (2x2=4 -> padded to 8), C = 32.
    B2, H2, C2 = 2, 4, 32
    x2 = jax.random.normal(k2, (B2, H2 * H2, C2), dtype=jnp.float32)
    out2 = jax.block_until_ready(fwd(x2, output_size=(2, 2)))
    ref2 = jax.block_until_ready(token_down_reference(x2, (2, 2)))
    err2 = float(jnp.max(jnp.abs(out2 - ref2)))
    assert out2.shape == (B2, 4, C2), out2.shape
    assert err2 < 1e-4, f"f32 max abs err too large: {err2}"

    # Test 3: larger batch exercising multi-block batch grid (BT > 1).
    B3 = 9
    x3 = jax.random.normal(k3, (B3, N, C), dtype=jnp.float32).astype(jnp.bfloat16)
    out3 = jax.block_until_ready(fwd(x3, output_size=OUT_HW))
    ref3 = jax.block_until_ready(token_down_reference(x3, OUT_HW))
    err3 = float(jnp.max(jnp.abs(out3.astype(jnp.float32) - ref3.astype(jnp.float32))))
    assert out3.shape == (B3, OUT_HW[0] * OUT_HW[1], C), out3.shape
    assert err3 < 5e-2, f"bf16 max abs err too large: {err3}"

    print("KERNEL_OK")
</pallas_src>

<mosaic_0001>
module attributes {stable_mosaic.version = 11 : i64} {
  func.func @token_down_kernel(%arg0: i32, %arg1: i32, %arg2: memref<2x64x128xbf16, #tpu.memory_space<vmem>>, %arg3: memref<16x64xbf16, #tpu.memory_space<vmem>>, %arg4: memref<2x16x128xbf16, #tpu.memory_space<vmem>>) attributes {dimension_semantics = [#tpu.dimension_semantics<parallel>, #tpu.dimension_semantics<parallel>], iteration_bounds = array<i64: 1, 1>, scalar_prefetch = 0 : i64, scratch_operands = 0 : i64, tpu.core_type = #tpu.core_type<tc>, window_params = [{transform_indices = @transform_0, window_bounds = array<i64: 2, 64, 128>}, {pipeline_mode = #tpu.pipeline_mode<synchronous>, transform_indices = @transform_1, window_bounds = array<i64: 16, 64>}, {transform_indices = @transform_2, window_bounds = array<i64: 2, 16, 128>}]} {
    %c0 = arith.constant 0 : index
    %c0_0 = arith.constant 0 : index
    %0 = vector.load %arg3[%c0, %c0_0] : memref<16x64xbf16, #tpu.memory_space<vmem>>, vector<16x64xbf16>
    %c0_i32 = arith.constant 0 : i32
    %1 = arith.index_cast %c0_i32 : i32 to index
    %c0_1 = arith.constant 0 : index
    %c0_2 = arith.constant 0 : index
    %2 = vector.load %arg2[%1, %c0_1, %c0_2] : memref<2x64x128xbf16, #tpu.memory_space<vmem>>, vector<1x64x128xbf16>
    %3 = vector.shape_cast %2 : vector<1x64x128xbf16> to vector<64x128xbf16>
    %cst = arith.constant dense<0.000000e+00> : vector<16x128xf32>
    %4 = tpu.matmul %0, %3, %cst {dimension_numbers = #tpu.dot_dimension_numbers<[1], [0], [0], [1], [0, 0, 1, 1], [], []>} : vector<16x64xbf16>, vector<64x128xbf16>, vector<16x128xf32> -> vector<16x128xf32>
    %5 = arith.truncf %4 : vector<16x128xf32> to vector<16x128xbf16>
    %6 = arith.index_cast %c0_i32 : i32 to index
    %c0_3 = arith.constant 0 : index
    %c0_4 = arith.constant 0 : index
    %7 = vector.load %arg4[%6, %c0_3, %c0_4] : memref<2x16x128xbf16, #tpu.memory_space<vmem>>, vector<1x16x128xbf16>
    %8 = vector.shape_cast %7 : vector<1x16x128xbf16> to vector<16x128xbf16>
    %9 = vector.shape_cast %5 : vector<16x128xbf16> to vector<1x16x128xbf16>
    tpu.vector_store %arg4[%6, %c0_3, %c0_4], %9 {strides = array<i32>} : memref<2x16x128xbf16, #tpu.memory_space<vmem>>, vector<1x16x128xbf16>,
    %c1_i32 = arith.constant 1 : i32
    %10 = arith.index_cast %c1_i32 : i32 to index
    %c0_5 = arith.constant 0 : index
    %c0_6 = arith.constant 0 : index
    %11 = vector.load %arg2[%10, %c0_5, %c0_6] : memref<2x64x128xbf16, #tpu.memory_space<vmem>>, vector<1x64x128xbf16>
    %12 = vector.shape_cast %11 : vector<1x64x128xbf16> to vector<64x128xbf16>
    %cst_7 = arith.constant dense<0.000000e+00> : vector<16x128xf32>
    %13 = tpu.matmul %0, %12, %cst_7 {dimension_numbers = #tpu.dot_dimension_numbers<[1], [0], [0], [1], [0, 0, 1, 1], [], []>} : vector<16x64xbf16>, vector<64x128xbf16>, vector<16x128xf32> -> vector<16x128xf32>
    %14 = arith.truncf %13 : vector<16x128xf32> to vector<16x128xbf16>
    %15 = arith.index_cast %c1_i32 : i32 to index
    %c0_8 = arith.constant 0 : index
    %c0_9 = arith.constant 0 : index
    %16 = vector.load %arg4[%15, %c0_8, %c0_9] : memref<2x16x128xbf16, #tpu.memory_space<vmem>>, vector<1x16x128xbf16>
    %17 = vector.shape_cast %16 : vector<1x16x128xbf16> to vector<16x128xbf16>
    %18 = vector.shape_cast %14 : vector<16x128xbf16> to vector<1x16x128xbf16>
    tpu.vector_store %arg4[%15, %c0_8, %c0_9], %18 {strides = array<i32>} : memref<2x16x128xbf16, #tpu.memory_space<vmem>>, vector<1x16x128xbf16>,
    %c2_i32 = arith.constant 2 : i32
    return
  }
  func.func @transform_0(%arg0: i32, %arg1: i32) -> (i32, i32, i32) {
    %c0_i32 = arith.constant 0 : i32
    %c0_i32_0 = arith.constant 0 : i32
    return %arg0, %c0_i32, %arg1 : i32, i32, i32
  }
  func.func @transform_1(%arg0: i32, %arg1: i32) -> (i32, i32) {
    %c0_i32 = arith.constant 0 : i32
    %c0_i32_0 = arith.constant 0 : i32
    %c0_i32_1 = arith.constant 0 : i32
    return %c0_i32, %c0_i32_0 : i32, i32
  }
  func.func @transform_2(%arg0: i32, %arg1: i32) -> (i32, i32, i32) {
    %c0_i32 = arith.constant 0 : i32
    %c0_i32_0 = arith.constant 0 : i32
    return %arg0, %c0_i32, %arg1 : i32, i32, i32
  }
}

</mosaic_0001>

<bundles_post_ra>
// kernel: token_down_forward.1
= control target key start
LH: loop header
LB: loop body
LE: loop exit
PB: predicated region body
PF: predicated region fallthrough
CT: control target
= control target key end

     0   :  { %7 = vsyncpa [#allocation3], 0  ;;  %s456_s0 = inlined_call_operand.hbm [shape: bf16[2,64,128], index: 0, kind: input, shape index: {}]   ;;  %s457_s1 = inlined_call_operand.hbm [shape: bf16[16,64], index: 1, kind: input, shape index: {}]   ;;  %s458_s2 = inlined_call_operand.hbm [shape: bf16[2,16,128], index: 2, kind: output, shape index: {}]  }
   0x1   :  { %8 = vsyncpa [#allocation6], 0 }
   0x2   :  { %9 = vsyncpa [#allocation4], 0  ;;  %s389_s9 = smov [#allocation2]   ;;  %s317_s13 = scalar_lea.hbm %s456_s0, 1024 }
   0x3   :  { %s15_s10 = sshll.u32 %s389_s9, 4  ;;  %p318_p0 = scmp.ne.s32.totalorder %s456_s0, %s317_s13  ;;  %s16_s10 = int_to_ptr.vmem [resolvable:$true] %s15_s10 }
   0x4   :  { %p321_p1 = scmp.lt.u32.totalorder %s317_s13, %s456_s0 }
   0x6   :  { %p323_p2 = pnand %p321_p1, %p318_p0 }
   0x8   :  { %326 = shalt.err (!%p323_p2)
}
   0x9   :  { %s327_s18 = scalar_lea.vmem %s16_s10, 1024  ;;  %p332_p4 = scmp.lt.s32.totalorder %s16_s10, %s16_s10 }
   0xa   :  { %p328_p3 = scmp.ne.s32.totalorder %s16_s10, %s327_s18  ;;  %p333_p5 = scmp.lt.s32.totalorder %s327_s18, %s327_s18 }
   0xc   :  { %p334_p6 = por %p333_p5, %p332_p4 }
   0xe   :  { %p335_p7 = pnand %p334_p6, %p328_p3 }
  0x10   :  { %338 = shalt.err (!%p335_p7)
}
  0x11   :  { %s390_s19 = smov 64   ;;  %s391_s20 = smov 4  }
  0x12   :  { %21 = dma.hbm_to_vmem [thread:$0]  %s456_s0, 1024, %s16_s10, [#allocation3], %s390_s19, %s390_s19, %s391_s20  }
  0x13   :  { %s392_s23 = smov [#allocation5]   ;;  %s339_s27 = scalar_lea.hbm %s457_s1, 128 }
  0x14   :  { %s27_s24 = sshll.u32 %s392_s23, 4  ;;  %p340_p8 = scmp.ne.s32.totalorder %s457_s1, %s339_s27  ;;  %s28_s24 = int_to_ptr.vmem [resolvable:$true] %s27_s24 }
  0x15   :  { %p343_p9 = scmp.lt.u32.totalorder %s339_s27, %s457_s1 }
  0x17   :  { %p345_p10 = pnand %p343_p9, %p340_p8 }
  0x19   :  { %348 = shalt.err (!%p345_p10)
}
  0x1a   :  { %s349_s4 = scalar_lea.vmem %s28_s24, 128  ;;  %p354_p12 = scmp.lt.s32.totalorder %s28_s24, %s28_s24 }
  0x1b   :  { %p350_p11 = scmp.ne.s32.totalorder %s28_s24, %s349_s4  ;;  %p355_p13 = scmp.lt.s32.totalorder %s349_s4, %s349_s4 }
  0x1d   :  { %p356_p0 = por %p355_p13, %p354_p12 }
  0x1f   :  { %p357_p1 = pnand %p356_p0, %p350_p11 }
  0x21   :  { %360 = shalt.err (!%p357_p1)
}
  0x22   :  { %33 = dma.hbm_to_vmem [thread:$0]  %s457_s1, 128, %s28_s24, [#allocation6], %s390_s19, %s390_s19, %s391_s20  }
  0x23   :  { %383 = dma.done.wait [#allocation3], 1024  }
  0x24   :  { %384 = vsyncadd [#allocation3], 4294966272 }
  0x25   :  { %385 = dma.done.wait [#allocation6], 128  }
  0x26   :  { %386 = vsyncadd [#allocation6], 4294967168  ;;  %v393_v0 = vmov 0.0   ;;  %vm394_vm0 = vmmov 0   ;;  %v308_v1 = vld [vmem:[#allocation2] sm:$0xff]   ;;  %v310_v3 = vld [vmem:[#allocation2 + $0x8] sm:$0xff]  }
  0x27   :  { %277 = vmatprep.subr.bf16.mxu0 %v393_v0  ;;  %289 = vmatprep.subr.bf16.mxu1 %v393_v0  ;;  %v309_v2 = vld [vmem:[#allocation2 + $0x20] sm:$0xff]   ;;  %v311_v4 = vld [vmem:[#allocation2 + $0x28] sm:$0xff]   ;;  %v312_v5 = vld [vmem:[#allocation2 + $0x10] sm:$0xff]   ;;  %vm80_vm1 = vcmask 523264   ;;  %s395_s1 = smov [#allocation7]  }
  0x28   :  { %285 = vmatprep.mubr.msk.bf16.mxu0 %vm394_vm0, %v393_v0  ;;  %297 = vmatprep.mubr.msk.bf16.mxu1 %vm394_vm0, %v393_v0  ;;  %v313_v6 = vld [vmem:[#allocation2 + $0x30] sm:$0xff]   ;;  %v314_v7 = vld [vmem:[#allocation2 + $0x18] sm:$0xff]   ;;  %v316_v9 = vld [vmem:[#allocation5] sm:$0xff]   ;;  %s225_s6 = sshll.u32 %s395_s1, 4  ;;  %s226_s6 = int_to_ptr.vmem [resolvable:$true] %s225_s6 }
  0x29   :  { %278 = vmatpush3.bf16.msra.mxu0 %v308_v1  ;;  %290 = vmatpush3.bf16.msra.mxu1 %v309_v2  ;;  %v315_v8 = vld [vmem:[#allocation2 + $0x38] sm:$0xff]   ;;  %s361_s7 = scalar_lea.vmem %s226_s6, 256  ;;  %p366_p3 = scmp.lt.s32.totalorder %s226_s6, %s226_s6 }
  0x2a   :  { %279 = vmatprep.subr.bf16.mxu0 %v393_v0  ;;  %291 = vmatprep.subr.bf16.mxu1 %v393_v0  ;;  %p362_p2 = scmp.ne.s32.totalorder %s226_s6, %s361_s7  ;;  %p367_p4 = scmp.lt.s32.totalorder %s361_s7, %s361_s7 }
  0x2c   :  { %p368_p5 = por %p367_p4, %p366_p3 }
  0x2d   :  { %280 = vmatpush3.bf16.msra.mxu0 %v310_v3  ;;  %292 = vmatpush3.bf16.msra.mxu1 %v311_v4 }
  0x2e   :  { %281 = vmatprep.subr.bf16.mxu0 %v393_v0  ;;  %293 = vmatprep.subr.bf16.mxu1 %v393_v0  ;;  %p369_p6 = pnand %p368_p5, %p362_p2 }
  0x31   :  { %282 = vmatpush3.bf16.msra.mxu0 %v312_v5  ;;  %294 = vmatpush3.bf16.msra.mxu1 %v313_v6 }
  0x32   :  { %283 = vmatprep.subr.bf16.mxu0 %v393_v0  ;;  %295 = vmatprep.subr.bf16.mxu1 %v393_v0 }
  0x35   :  { %284 = vmatpush3.bf16.msra.mxu0 %v314_v7  ;;  %296 = vmatpush3.bf16.msra.mxu1 %v315_v8 }
  0x38   :  { %286 = vmatmul.mubr.msk.bf16.vlgmr.msra.gmra.mrb[0].mxu0 %vm80_vm1, %v316_v9  ;;  %298 = vmatmul.mubr.msk.bf16.vlgmr.msra.gmra.mrb[0].mxu1 %vm80_vm1, %v316_v9 }
 0x10b   :  { %v118_v10 = vpop.f32.mrb[0].mxu0  ;;  %v202_v11 = vpop.f32.mrb[0].mxu1 }
 0x10c   :  { %v287_v12 = vpop.f32.mrb[1].mxu0  ;;  %v299_v13 = vpop.f32.mrb[1].mxu1 }
 0x10d   :  { %v121_v14 = vpop.f32.mrb[2].mxu0  ;;  %v205_v16 = vpop.f32.mrb[2].mxu1 }
 0x10e   :  { %v260_v15 = vpack.c.bf16 %v121_v14, %v118_v10  ;;  %v288_v17 = vpop.f32.mrb[3].mxu0  ;;  %v265_v18 = vpack.c.bf16 %v205_v16, %v202_v11  ;;  %v300_v19 = vpop.f32.mrb[3].mxu1 }
 0x110   :  { %261 = vst [vmem:[#allocation7] sm:$0xff] %v260_v15   ;;  %266 = vst [vmem:[#allocation7 + $0x8] sm:$0xff] %v265_v18  }
 0x111   :  { %372 = shalt.err (!%p369_p6)
}
 0x112   :  { %s373_s10 = scalar_lea.hbm %s458_s2, 256 }
 0x113   :  { %p374_p7 = scmp.ne.s32.totalorder %s458_s2, %s373_s10  ;;  %p377_p8 = scmp.lt.u32.totalorder %s373_s10, %s458_s2 }
 0x115   :  { %p379_p9 = pnand %p377_p8, %p374_p7 }
 0x117   :  { %382 = shalt.err (!%p379_p9)
}
 0x118   :  { %231 = dma.vmem_to_hbm [thread:$0]  %s226_s6, 256, %s458_s2, [#allocation4], %s390_s19, %s390_s19, %s391_s20  }
 0x119   :  { %387 = dma.done.wait [#allocation4], 256  }
 0x11a   :  { %388 = vsyncadd [#allocation4], 4294967040 }
 0x11b   :  { %235 = vsyncpa [#allocation3], 1 }
 0x11c   :  { %236 = vsyncpa [#allocation6], 1 }
 0x11d   :  { %237 = vsyncpa [#allocation4], 1 }

</bundles_post_ra>
